<compile_context>
chip_gen: v7x
topology: tpu7x:2x2x1
jax: 0.10.0
libtpu: 0.0.40
codegen_flags: <defaults>
</compile_context>

<pallas_src>
import functools

import jax
import jax.numpy as jnp
import numpy as np
from jax.experimental import pallas as pl
from jax.experimental.pallas import tpu as pltpu


def _round_up(n, m):
    return ((n + m - 1) // m) * m


def _conv_gn_lrelu_kernel(p_ref, w_ref, gamma_ref, beta_ref, out_ref, *,
                          inv_count, eps, negative_slope):
    # p_ref     : (1, HW_p, K_p)    im2col patches (mxu dtype), zero-padded rows/lanes
    # w_ref     : (K_p, Cout_p)     im2col conv weight (mxu dtype), zero-padded
    # gamma_ref : (1, Cout_p)       GroupNorm scale (f32, zero in padded lanes)
    # beta_ref  : (1, Cout_p)       GroupNorm shift (f32, zero in padded lanes)
    # out_ref   : (1, HW_p, Cout_p)
    acc = jnp.dot(p_ref[0], w_ref[...],
                  preferred_element_type=jnp.float32)      # (HW_p, Cout_p) f32

    # GroupNorm(num_groups=1): biased mean/var over the REAL (C, H, W) elements
    # (eps=1e-5, matching PyTorch).  Padded K lanes / HW rows / Cout lanes all
    # contribute exact zeros to the conv output, so plain sums are correct when
    # divided by the true element count.  One traversal of acc: sublane-reduce
    # into (1, Cout_p) partials, then a single cross-lane (XLU) reduce.
    col_sum = jnp.sum(acc, axis=0, keepdims=True)           # (1, Cout_p)
    col_sumsq = jnp.sum(acc * acc, axis=0, keepdims=True)   # (1, Cout_p)
    mean = jnp.sum(col_sum) * inv_count
    # NOTE: one-pass E[x^2]-mean^2 in f32 is adequate for post-conv activations of
    # moderate magnitude.  TODO(synk): switch to a centered second pass (Welford)
    # if this block is used where |mean| >> std of the conv output.
    var = jnp.maximum(jnp.sum(col_sumsq) * inv_count - mean * mean, 0.0)
    inv_std = jax.lax.rsqrt(var + eps)                       # EUP slot

    # Fold normalization + affine into one per-channel scale/shift FMA.
    scale = gamma_ref[...] * inv_std                         # (1, Cout_p)
    shift = beta_ref[...] - mean * scale                     # (1, Cout_p)
    y = acc * scale + shift
    y = jnp.where(y >= 0, y, negative_slope * y)             # LeakyReLU(0.2)
    out_ref[0] = y.astype(out_ref.dtype)


def conv2d_norm_lrelu_nhwc(x_nhwc, w_oihw, gamma, beta, *, mxu_dtype=jnp.bfloat16):
    """Fused Conv2DNormLReLU on an NHWC activation.

    x_nhwc : (B, H, W, Cin) float32
    w_oihw : (Cout, Cin, 3, 3) conv weight (PyTorch OIHW layout), bias=False
    gamma, beta : (Cout,) GroupNorm affine parameters
    mxu_dtype : matmul-operand dtype.  bf16 (+ f32 accumulation) is the production
                configuration on v5e/v6e/v7x; float32 operands are for testing only.
    returns (B, H, W, Cout) in x_nhwc.dtype.

    Use this entry point directly when stacking layers so activations stay in NHWC
    between layers (the NCHW wrapper below only exists for PyTorch-layout parity).
    """
    B, H, W, Cin = x_nhwc.shape
    Cout, Cin_w, KH, KW = w_oihw.shape
    assert Cin_w == Cin and KH == 3 and KW == 3, "kernel supports k=3, s=1, p=1"

    K = KH * KW * Cin
    K_p = _round_up(K, 128)
    # v6e/v7x MXUs are 256 wide in N; only bother padding to 256 when there is real
    # data to fill it (tiny Cout stays at one 128-lane tile).
    Cout_p = _round_up(Cout, 256) if Cout >= 128 else _round_up(Cout, 128)
    HW = H * W
    HW_p = _round_up(HW, 8)

    # --- wrapper-side im2col (small-channel regime), cast to MXU dtype ONCE -----
    # K ordering is (ki, kj, cin), matching the weight reshape below.
    x_pad = jnp.pad(x_nhwc, ((0, 0), (1, 1), (1, 1), (0, 0)))
    taps = [x_pad[:, ki:ki + H, kj:kj + W, :]
            for ki in range(KH) for kj in range(KW)]
    patches = jnp.concatenate(taps, axis=-1).reshape(B, HW, K)
    patches = jnp.pad(patches, ((0, 0), (0, HW_p - HW), (0, K_p - K)))
    patches = patches.astype(mxu_dtype)

    # OIHW -> (KH, KW, Cin, Cout) -> (K, Cout), zero-padded to (K_p, Cout_p).
    w2 = jnp.transpose(w_oihw, (2, 3, 1, 0)).reshape(K, Cout)
    w2 = jnp.pad(w2, ((0, K_p - K), (0, Cout_p - Cout))).astype(mxu_dtype)

    gamma2 = jnp.pad(gamma.astype(jnp.float32), (0, Cout_p - Cout)).reshape(1, Cout_p)
    beta2 = jnp.pad(beta.astype(jnp.float32), (0, Cout_p - Cout)).reshape(1, Cout_p)

    kernel = functools.partial(
        _conv_gn_lrelu_kernel,
        inv_count=1.0 / float(HW * Cout), eps=1e-5, negative_slope=0.2)

    op_bytes = jnp.dtype(mxu_dtype).itemsize
    out_bytes = jnp.dtype(x_nhwc.dtype).itemsize
    cost = pl.CostEstimate(
        flops=2 * B * HW_p * K_p * Cout_p,
        transcendentals=B,  # one rsqrt per sample
        bytes_accessed=(B * HW_p * K_p * op_bytes
                        + K_p * Cout_p * op_bytes
                        + 2 * Cout_p * 4
                        + B * HW_p * Cout_p * out_bytes),
    )

    out = pl.pallas_call(
        kernel,
        out_shape=jax.ShapeDtypeStruct((B, HW_p, Cout_p), x_nhwc.dtype),
        grid_spec=pltpu.PrefetchScalarGridSpec(
            num_scalar_prefetch=0,
            grid=(B,),
            in_specs=[
                pl.BlockSpec((1, HW_p, K_p), lambda b: (b, 0, 0)),
                # Grid-invariant operands: single-buffered (constant index_map
                # already avoids re-DMA; Buffered(1) just halves their residency).
                pl.BlockSpec((K_p, Cout_p), lambda b: (0, 0),
                             pipeline_mode=pl.Buffered(1)),
                pl.BlockSpec((1, Cout_p), lambda b: (0, 0),
                             pipeline_mode=pl.Buffered(1)),
                pl.BlockSpec((1, Cout_p), lambda b: (0, 0),
                             pipeline_mode=pl.Buffered(1)),
            ],
            out_specs=pl.BlockSpec((1, HW_p, Cout_p), lambda b: (b, 0, 0)),
        ),
        compiler_params=pltpu.CompilerParams(
            dimension_semantics=("parallel",),
            vmem_limit_bytes=32 * 1024 * 1024,  # explicit; safe on v5e/v6e/v7x
        ),
        cost_estimate=cost,
    )(patches, w2, gamma2, beta2)

    # Strip row / channel padding.
    return out[:, :HW, :Cout].reshape(B, H, W, Cout)


def conv2d_norm_lrelu(x_nchw, w_oihw, gamma, beta, *, mxu_dtype=jnp.bfloat16):
    """NCHW wrapper matching the PyTorch module's layout."""
    x_nhwc = jnp.transpose(x_nchw, (0, 2, 3, 1))
    out_nhwc = conv2d_norm_lrelu_nhwc(x_nhwc, w_oihw, gamma, beta,
                                      mxu_dtype=mxu_dtype)
    return jnp.transpose(out_nhwc, (0, 3, 1, 2))


def _reference(x_nchw, w_oihw, gamma, beta):
    """Pure-JAX f32 reference mirroring the PyTorch module."""
    conv = jax.lax.conv_general_dilated(
        x_nchw, w_oihw,
        window_strides=(1, 1),
        padding=((1, 1), (1, 1)),
        dimension_numbers=("NCHW", "OIHW", "NCHW"),
    )
    B, C, H, W = conv.shape
    flat = conv.reshape(B, -1)
    mean = flat.mean(axis=1, keepdims=True)
    var = ((flat - mean) ** 2).mean(axis=1, keepdims=True)
    norm = ((flat - mean) / jnp.sqrt(var + 1e-5)).reshape(B, C, H, W)
    norm = norm * gamma.reshape(1, C, 1, 1) + beta.reshape(1, C, 1, 1)
    return jnp.where(norm >= 0, norm, 0.2 * norm)


if __name__ == "__main__":
    key = jax.random.PRNGKey(0)
    k_x, k_w, k_g, k_b = jax.random.split(key, 4)

    B, Cin, Cout, H, W = 2, 4, 8, 16, 16

    x = jax.random.normal(k_x, (B, Cin, H, W), dtype=jnp.float32)
    # Deterministic synthetic weights (nn.Conv2d-like scale), bias=False.
    fan_in = Cin * 3 * 3
    w = jax.random.uniform(
        k_w, (Cout, Cin, 3, 3), dtype=jnp.float32,
        minval=-1.0 / np.sqrt(fan_in), maxval=1.0 / np.sqrt(fan_in))
    # GroupNorm affine params; perturb away from ones/zeros to exercise the affine path.
    gamma = 1.0 + 0.1 * jax.random.normal(k_g, (Cout,), dtype=jnp.float32)
    beta = 0.1 * jax.random.normal(k_b, (Cout,), dtype=jnp.float32)

    ref = jax.block_until_ready(_reference(x, w, gamma, beta))

    # 1) f32 MXU operands: tight check against the f32 reference (test-only path).
    out_f32 = jax.block_until_ready(
        conv2d_norm_lrelu(x, w, gamma, beta, mxu_dtype=jnp.float32))
    np.testing.assert_allclose(np.asarray(out_f32), np.asarray(ref),
                               rtol=1e-4, atol=1e-4)

    # 2) Production bf16 MXU operands + f32 accumulation: looser tolerance.
    out_bf16 = jax.block_until_ready(conv2d_norm_lrelu(x, w, gamma, beta))
    np.testing.assert_allclose(np.asarray(out_bf16), np.asarray(ref),
                               rtol=3e-2, atol=3e-2)

    print("KERNEL_OK")
</pallas_src>

<mosaic_0001>
module attributes {stable_mosaic.version = 11 : i64} {
  func.func @_conv_gn_lrelu_kernel(%arg0: i32, %arg1: memref<1x256x128xf32, #tpu.memory_space<vmem>>, %arg2: memref<128x128xf32, #tpu.memory_space<vmem>>, %arg3: memref<1x128xf32, #tpu.memory_space<vmem>>, %arg4: memref<1x128xf32, #tpu.memory_space<vmem>>, %arg5: memref<1x256x128xf32, #tpu.memory_space<vmem>>) attributes {dimension_semantics = [#tpu.dimension_semantics<parallel>], iteration_bounds = array<i64: 2>, scalar_prefetch = 0 : i64, scratch_operands = 0 : i64, tpu.core_type = #tpu.core_type<tc>, window_params = [{transform_indices = @transform_0, window_bounds = array<i64: 1, 256, 128>}, {pipeline_mode = #tpu.pipeline_mode<synchronous>, transform_indices = @transform_1, window_bounds = array<i64: 128, 128>}, {pipeline_mode = #tpu.pipeline_mode<synchronous>, transform_indices = @transform_2, window_bounds = array<i64: 1, 128>}, {pipeline_mode = #tpu.pipeline_mode<synchronous>, transform_indices = @transform_3, window_bounds = array<i64: 1, 128>}, {transform_indices = @transform_4, window_bounds = array<i64: 1, 256, 128>}]} {
    %c0 = arith.constant 0 : index
    %c0_0 = arith.constant 0 : index
    %c0_1 = arith.constant 0 : index
    %0 = vector.load %arg1[%c0, %c0_0, %c0_1] : memref<1x256x128xf32, #tpu.memory_space<vmem>>, vector<1x256x128xf32>
    %1 = vector.shape_cast %0 : vector<1x256x128xf32> to vector<256x128xf32>
    %c0_2 = arith.constant 0 : index
    %c0_3 = arith.constant 0 : index
    %2 = vector.load %arg2[%c0_2, %c0_3] : memref<128x128xf32, #tpu.memory_space<vmem>>, vector<128x128xf32>
    %cst = arith.constant dense<0.000000e+00> : vector<256x128xf32>
    %3 = tpu.matmul %1, %2, %cst {dimension_numbers = #tpu.dot_dimension_numbers<[1], [0], [0], [1], [0, 0, 1, 1], [], []>} : vector<256x128xf32>, vector<128x128xf32>, vector<256x128xf32> -> vector<256x128xf32>
    %cst_4 = arith.constant dense<0.000000e+00> : vector<128xf32>
    %4 = vector.multi_reduction <add>, %3, %cst_4 [0] : vector<256x128xf32> to vector<128xf32>
    %5 = vector.shape_cast %4 : vector<128xf32> to vector<1x128xf32>
    %6 = arith.mulf %3, %3 : vector<256x128xf32>
    %cst_5 = arith.constant dense<0.000000e+00> : vector<128xf32>
    %7 = vector.multi_reduction <add>, %6, %cst_5 [0] : vector<256x128xf32> to vector<128xf32>
    %8 = vector.shape_cast %7 : vector<128xf32> to vector<1x128xf32>
    %9 = vector.shape_cast %5 : vector<1x128xf32> to vector<1x1x128xf32>
    %cst_6 = arith.constant dense<0.000000e+00> : vector<1xf32>
    %10 = vector.multi_reduction <add>, %9, %cst_6 [1, 2] : vector<1x1x128xf32> to vector<1xf32>
    %11 = vector.shape_cast %10 : vector<1xf32> to vector<1x1x1xf32>
    %12 = vector.extract %11[0, 0, 0] : f32 from vector<1x1x1xf32>
    %cst_7 = arith.constant 4.8828125E-4 : f32
    %13 = arith.mulf %12, %cst_7 : f32
    %14 = vector.shape_cast %8 : vector<1x128xf32> to vector<1x1x128xf32>
    %cst_8 = arith.constant dense<0.000000e+00> : vector<1xf32>
    %15 = vector.multi_reduction <add>, %14, %cst_8 [1, 2] : vector<1x1x128xf32> to vector<1xf32>
    %16 = vector.shape_cast %15 : vector<1xf32> to vector<1x1x1xf32>
    %17 = vector.extract %16[0, 0, 0] : f32 from vector<1x1x1xf32>
    %cst_9 = arith.constant 4.8828125E-4 : f32
    %18 = arith.mulf %17, %cst_9 : f32
    %19 = arith.mulf %13, %13 : f32
    %20 = arith.subf %18, %19 : f32
    %cst_10 = arith.constant 0.000000e+00 : f32
    %21 = arith.maximumf %20, %cst_10 : f32
    %cst_11 = arith.constant 9.99999974E-6 : f32
    %22 = arith.addf %21, %cst_11 : f32
    %23 = math.rsqrt %22 : f32
    %c0_12 = arith.constant 0 : index
    %c0_13 = arith.constant 0 : index
    %24 = vector.load %arg3[%c0_12, %c0_13] : memref<1x128xf32, #tpu.memory_space<vmem>>, vector<1x128xf32>
    %25 = vector.broadcast %23 : f32 to vector<1x128xf32>
    %26 = arith.mulf %24, %25 : vector<1x128xf32>
    %c0_14 = arith.constant 0 : index
    %c0_15 = arith.constant 0 : index
    %27 = vector.load %arg4[%c0_14, %c0_15] : memref<1x128xf32, #tpu.memory_space<vmem>>, vector<1x128xf32>
    %28 = vector.broadcast %13 : f32 to vector<1x128xf32>
    %29 = arith.mulf %28, %26 : vector<1x128xf32>
    %30 = arith.subf %27, %29 : vector<1x128xf32>
    %31 = vector.broadcast %26 : vector<1x128xf32> to vector<256x128xf32>
    %32 = arith.mulf %3, %31 : vector<256x128xf32>
    %33 = vector.broadcast %30 : vector<1x128xf32> to vector<256x128xf32>
    %34 = arith.addf %32, %33 : vector<256x128xf32>
    %cst_16 = arith.constant 0.000000e+00 : f32
    %35 = vector.broadcast %cst_16 : f32 to vector<256x128xf32>
    %36 = arith.cmpf oge, %34, %35 : vector<256x128xf32>
    %cst_17 = arith.constant 2.000000e-01 : f32
    %37 = vector.broadcast %cst_17 : f32 to vector<256x128xf32>
    %38 = arith.mulf %37, %34 : vector<256x128xf32>
    %39 = arith.select %36, %34, %38 : vector<256x128xi1>, vector<256x128xf32>
    %c0_18 = arith.constant 0 : index
    %c0_19 = arith.constant 0 : index
    %c0_20 = arith.constant 0 : index
    %40 = vector.load %arg5[%c0_18, %c0_19, %c0_20] : memref<1x256x128xf32, #tpu.memory_space<vmem>>, vector<1x256x128xf32>
    %41 = vector.shape_cast %40 : vector<1x256x128xf32> to vector<256x128xf32>
    %42 = vector.shape_cast %39 : vector<256x128xf32> to vector<1x256x128xf32>
    tpu.vector_store %arg5[%c0_18, %c0_19, %c0_20], %42 {strides = array<i32>} : memref<1x256x128xf32, #tpu.memory_space<vmem>>, vector<1x256x128xf32>,
    return
  }
  func.func @transform_0(%arg0: i32) -> (i32, i32, i32) {
    %c0_i32 = arith.constant 0 : i32
    %c0_i32_0 = arith.constant 0 : i32
    %c0_i32_1 = arith.constant 0 : i32
    return %arg0, %c0_i32, %c0_i32_0 : i32, i32, i32
  }
  func.func @transform_1(%arg0: i32) -> (i32, i32) {
    %c0_i32 = arith.constant 0 : i32
    %c0_i32_0 = arith.constant 0 : i32
    %c0_i32_1 = arith.constant 0 : i32
    return %c0_i32, %c0_i32_0 : i32, i32
  }
  func.func @transform_2(%arg0: i32) -> (i32, i32) {
    %c0_i32 = arith.constant 0 : i32
    %c0_i32_0 = arith.constant 0 : i32
    %c0_i32_1 = arith.constant 0 : i32
    return %c0_i32, %c0_i32_0 : i32, i32
  }
  func.func @transform_3(%arg0: i32) -> (i32, i32) {
    %c0_i32 = arith.constant 0 : i32
    %c0_i32_0 = arith.constant 0 : i32
    %c0_i32_1 = arith.constant 0 : i32
    return %c0_i32, %c0_i32_0 : i32, i32
  }
  func.func @transform_4(%arg0: i32) -> (i32, i32, i32) {
    %c0_i32 = arith.constant 0 : i32
    %c0_i32_0 = arith.constant 0 : i32
    %c0_i32_1 = arith.constant 0 : i32
    return %arg0, %c0_i32, %c0_i32_0 : i32, i32, i32
  }
}

</mosaic_0001>

<bundles_post_ra>
// kernel: tpu_custom_call.1
= control target key start
LH: loop header
LB: loop body
LE: loop exit
PB: predicated region body
PF: predicated region fallthrough
CT: control target
= control target key end

     0   :  { %9 = vsyncpa [#allocation3], 0  ;;  %s2071_s0 = inlined_call_operand.hbm [shape: f32[2,256,128], index: 0, kind: input, shape index: {}]   ;;  %s2072_s1 = inlined_call_operand.hbm [shape: f32[128,128], index: 1, kind: input, shape index: {}]   ;;  %s2073_s2 = inlined_call_operand.vmem [shape: f32[1,128], index: 2, kind: input, shape index: {}]   ;;  %s2074_s3 = inlined_call_operand.vmem [shape: f32[1,128], index: 3, kind: input, shape index: {}]   ;;  %s2075_s4 = inlined_call_operand.hbm [shape: f32[2,256,128], index: 4, kind: output, shape index: {}]  }
   0x1   :  { %11 = vsyncpa [#allocation3 + $0x1], 0 }
   0x2   :  { %12 = vsyncpa [#allocation6], 0 }
   0x3   :  { %13 = vsyncpa [#allocation4], 0 }
   0x4   :  { %15 = vsyncpa [#allocation4 + $0x1], 0  ;;  %s1375_s15 = smov 0   ;;  %s1377_s16 = smov 0  }
   0x5   :  { %s1379_s17 = smov 0   ;;  %s1381_s18 = smov 0  }
   0x6 LB: > { %s1396_s19 = sadd.s32 4294967295, %s1340_s18   ;;  %s948_s20 = sadd.s32 4294967294, %s1340_s18   ;;  %s1340_s18 = sphi %s1381_s18, %s2109_s18   ;;  %s1336_s17 = sphi %s1379_s17, %s2108_s17   ;;  %s1332_s16 = sphi %s1377_s16, %s2107_s16   ;;  %s1328_s15 = sphi %s1375_s15, %s2106_s15  }
   0x7   : > { %p41_p0 = scmp.ne.s32.totalorder %s1332_s16, %s1328_s15  ;;  %p2076_p1 = scmp.eq.s32.totalorder %s1396_s19, 0 }
   0x8   : > { %p134_p3 = scmp.eq.s32.totalorder %s948_s20, 1  ;;  %p949_p5 = scmp.ge.s32.totalorder %s1340_s18, 1 }
   0x9   : > { %p1405_p4 = por %p2076_p1, %p41_p0  ;;  %p141_p7 = scmp.lt.s32.totalorder %s1340_s18, 3 }
   0xa   : > { %p1410_p6 = por %p134_p3, %p41_p0  ;;  %s1342_s24 = smov [#allocation5]  }
   0xb   : > { %s2079_s21 = scalar_select %p1405_p4, 1, 0 }
   0xc   : > { %s2080_s22 = scalar_select %p1410_p6, 1, 0 }
   0xd   : > { %p1415_p8 = pnand %p949_p5, %p141_p7  ;;  %s153_s25 = sshll.u32 %s1342_s24, 4  ;;  %s1419_s25 = int_to_ptr.vmem [resolvable:$true] %s153_s25 }
   0xe   : > { %s1431_s27 = sadd.s32 1, %s1340_s18   ;;  %s28_s28 = sadd.s32 1, %s1336_s17 }
   0xf   : > { %s2081_s23 = scalar_select %p1415_p8, 1, 0 }
  0x10   : > { %p1156_p9 = pneg %p1415_p8  ;;  %s25_s29 = ssub.s32 %s1340_s18, %s1431_s27 }
  0x11   : > { %s1212_s6 = scalar_lea.hbm %s2072_s1, 2048 }
  0x12   : > { %p1426_p11 = pnand %p1156_p9, %p2076_p1  ;;  %p1213_p12 = scmp.ne.s32.totalorder %s2072_s1, %s1212_s6 }
  0x13   : > { %p1219_p5 = scmp.lt.u32.totalorder %s1212_s6, %s2072_s1 }
  0x14   : > { %p1214_p13 = pneg %p1426_p11 }
  0x16   : > { %p1215_p0 = pnand %p1214_p13, %p1213_p12 }
  0x18   : > { %p1216_p3 = pneg %p1215_p0 }
  0x1a   : > { %p1221_p7 = pnand %p1219_p5, %p1216_p3 }
  0x1c   : > { %1224 = shalt.err (!%p1221_p7)
}
  0x1d   : > { %s1225_s11 = scalar_lea.vmem %s1419_s25, 2048  ;;  %p1233_p2 = scmp.lt.s32.totalorder %s1419_s25, %s1419_s25 }
  0x1e   : > { %p1226_p9 = scmp.ne.s32.totalorder %s1419_s25, %s1225_s11  ;;  %p1234_p6 = scmp.lt.s32.totalorder %s1225_s11, %s1225_s11 }
  0x20   : > { %p1228_p10 = pnand %p1226_p9, %p1214_p13  ;;  %p1235_p4 = por %p1234_p6, %p1233_p2 }
  0x22   : > { %p1229_p1 = pneg %p1228_p10 }
  0x24   : > { %p1236_p8 = pnand %p1235_p4, %p1229_p1 }
  0x26   : > { %1239 = shalt.err (!%p1236_p8)
}
  0x27   : > { %s1343_s12 = smov 128   ;;  %s1344_s13 = smov 8  }
  0x28   : > { %1159 = dma.hbm_to_vmem [thread:$0]  (!%p1426_p11), %s2072_s1, 2048, %s1419_s25, [#allocation6], %s1343_s12, %s1343_s12, %s1344_s13  }
  0x29   : > { %p26_p1 = scmp.eq.s32.totalorder %s25_s29, 0  ;;  %p35_p2 = scmp.ne.s32.totalorder %s1336_s17, %s1332_s16 }
  0x2a   : > { %p36_p4 = scmp.eq.s32.totalorder %s1340_s18, 0  ;;  %p1169_p6 = scmp.lt.s32.totalorder %s1340_s18, 2 }
  0x2b   : > { %s1465_s24 = scalar_select %p26_p1, %s1336_s17, %s28_s28  }
  0x2c   : > { %p37_p8 = por %p36_p4, %p35_p2  ;;  %p2083_p10 = scmp.eq.s32.totalorder %s1396_s19, 1 }
  0x2d   : > { %s173_s26 = sand.u32 1, %s1336_s17   ;;  %s964_s5 = sshll.u32 %s1340_s18, 12 }
  0x2e   : > { %p1469_p12 = por %p2083_p10, %p35_p2  ;;  %s952_s6 = sshll.u32 %s173_s26, 8 }
  0x2f   : > { %s1478_s9 = scalar_lea.hbm %s2071_s0, %s964_s5  ;;  %s177_s25 = scalar_lea.vmem [#allocation2], %s952_s6 }
  0x30   : > { %s184_s28 = sshll.u32 %s177_s25, 4  ;;  %p1480_p11 = pnand %p1169_p6, %p37_p8  ;;  %s1484_s28 = int_to_ptr.vmem [resolvable:$true] %s184_s28 }
  0x31   : > { %s1486_s10 = scalar_lea.sflag [#allocation3], %s173_s26  ;;  %s1240_s11 = scalar_lea.hbm %s1478_s9, 4096 }
  0x32   : > { %p1241_p13 = scmp.ne.s32.totalorder %s1478_s9, %s1240_s11  ;;  %p1242_p0 = pneg %p1480_p11 }
  0x33   : > { %s1245_s5 = scalar_lea.hbm %s2071_s0, 8192  ;;  %p1246_p7 = scmp.lt.u32.totalorder %s1478_s9, %s2071_s0 }
  0x34   : > { %p1243_p3 = pnand %p1242_p0, %p1241_p13  ;;  %p1247_p9 = scmp.lt.u32.totalorder %s1245_s5, %s1240_s11 }
  0x35   : > { %p1249_p2 = scmp.lt.u32.totalorder %s1240_s11, %s1478_s9 }
  0x36   : > { %p1244_p5 = pneg %p1243_p3  ;;  %p1248_p1 = por %p1247_p9, %p1246_p7 }
  0x38   : > { %p1250_p4 = por %p1249_p2, %p1248_p1 }
  0x3a   : > { %p1251_p6 = pnand %p1250_p4, %p1244_p5 }
  0x3c   : > { %1254 = shalt.err (!%p1251_p6)
}
  0x3d   : > { %s1255_s26 = scalar_lea.vmem %s1484_s28, 4096  ;;  %s1345_s8 = smov [#allocation2]  }
  0x3e   : > { %p1256_p8 = scmp.ne.s32.totalorder %s1484_s28, %s1255_s26  ;;  %s1260_s25 = sshll.u32 %s1345_s8, 4  ;;  %s1261_s25 = int_to_ptr.vmem [resolvable:$false] %s1260_s25 }
  0x3f   : > { %s1262_s14 = scalar_lea.vmem %s1261_s25, 8192  ;;  %p1263_p3 = scmp.lt.s32.totalorder %s1484_s28, %s1261_s25 }
  0x40   : > { %p1258_p10 = pnand %p1256_p8, %p1242_p0  ;;  %p1264_p7 = scmp.lt.s32.totalorder %s1262_s14, %s1255_s26 }
  0x42   : > { %p1259_p13 = pneg %p1258_p10  ;;  %p1265_p9 = por %p1264_p7, %p1263_p3 }
  0x44   : > { %p1266_p1 = pnand %p1265_p9, %p1259_p13 }
  0x46   : > { %1269 = shalt.err (!%p1266_p1)
}
  0x47   : > { %1163 = dma.hbm_to_vmem [thread:$0]  (!%p1480_p11), %s1478_s9, 4096, %s1484_s28, %s1486_s10, %s1343_s12, %s1343_s12, %s1344_s13  }
  0x48   : > { %p2086_p0 = scmp.ne.s32.totalorder %s2081_s23, 0 }
  0x49   : > { %s1520_s11 = sand.u32 (!%p2086_p0), 1, %s1332_s16   ;;  %p2087_p5 = scmp.ne.s32.totalorder (!%p2086_p0), %s2079_s21, 0 }
  0x4a   : > { %196 = sbr.rel (%p2086_p0) target bundleno = 751 (0x2ef), region = 36  ;;  %s956_s20 = sshll.u32 (!%p2086_p0), %s1520_s11, 8 }
  0x4b   : > { %s199_s5 = scalar_lea.sflag (!%p2086_p0), [#allocation3], %s1520_s11  ;;  %s1526_s29 = scalar_lea.vmem (!%p2086_p0), [#allocation2], %s956_s20 }
  0x51   : > { %1315 = dma.done.wait (%p2087_p5), %s199_s5, 4096  }
  0x52   : > { %1317 = vsyncadd (%p2087_p5), %s199_s5, 4294963200  ;;  %p2088_p11 = scmp.eq.s32.totalorder %s1396_s19, 0 }
  0x54   : > { %1319 = dma.done.wait (%p2088_p11), [#allocation6], 2048   ;;  %p2089_p2 = pmov %p2088_p11 }
  0x55   : > { %v263_v0 = vld [vmem:[#allocation5] sm:$0xff]  ;;  %v264_v1 = vld [vmem:[#allocation5 + $0x8] sm:$0xff]  ;;  %v265_v2 = vld [vmem:[#allocation5 + $0x10] sm:$0xff]  ;;  %vm610_vm0 = vcmask 1040384   ;;  %s1346_s10 = smov 0.0  }
  0x56   : > { %1321 = vsyncadd (%p2089_p2), [#allocation6], 4294965248  ;;  %v1094_v3 = vpack.c.bf16 %v264_v1, %v263_v0  ;;  %v266_v4 = vld [vmem:[#allocation5 + $0x18] sm:$0xff]  ;;  %v267_v6 = vld [vmem:[#allocation5 + $0x20] sm:$0xff] }
  0x57   : > { %v1098_v5 = vpack.c.bf16 %v266_v4, %v265_v2  ;;  %v268_v7 = vld [vmem:[#allocation5 + $0x28] sm:$0xff]  ;;  %v231_v9 = vld [vmem:[%s1526_s29] sm:$0xff]  ;;  %v269_v10 = vld [vmem:[#allocation5 + $0x30] sm:$0xff] }
  0x58   : > { %1095 = vmatprep.subr.bf16.mxu0 %v1094_v3  ;;  %1126 = vmatprep.subr.bf16.mxu1 %v1094_v3  ;;  %v1102_v8 = vpack.c.bf16 %v268_v7, %v267_v6  ;;  %v270_v11 = vld [vmem:[#allocation5 + $0x38] sm:$0xff]  ;;  %v271_v13 = vld [vmem:[#allocation5 + $0x40] sm:$0xff]  ;;  %v272_v14 = vld [vmem:[#allocation5 + $0x48] sm:$0xff] }
  0x59   : > { %1097 = vmatpush3.bf16.msra.mxu0 %v1094_v3  ;;  %1134 = vmatpush3.bf16.msra.mxu1 %v1094_v3  ;;  %v1106_v12 = vpack.c.bf16 %v270_v11, %v269_v10  ;;  %v247_v15 = vld [vmem:[%s1526_s29 + $0x80] sm:$0xff]  ;;  %v1110_v16 = vpack.c.bf16 %v272_v14, %v271_v13  ;;  %v273_v17 = vld [vmem:[#allocation5 + $0x50] sm:$0xff]  ;;  %v274_v18 = vld [vmem:[#allocation5 + $0x58] sm:$0xff] }
  0x5a   : > { %1099 = vmatprep.subr.bf16.mxu0 %v1098_v5  ;;  %1127 = vmatprep.subr.bf16.mxu1 %v1098_v5  ;;  %v1114_v19 = vpack.c.bf16 %v274_v18, %v273_v17  ;;  %v275_v20 = vld [vmem:[#allocation5 + $0x60] sm:$0xff]  ;;  %v276_v21 = vld [vmem:[#allocation5 + $0x68] sm:$0xff]  ;;  %v277_v23 = vld [vmem:[#allocation5 + $0x70] sm:$0xff] }
  0x5b   : > { %1046 = vmatprep.mubr.f32.mxu0 %v231_v9  ;;  %1070 = vmatprep.mubr.f32.mxu1 %v247_v15  ;;  %v1118_v22 = vpack.c.bf16 %v276_v21, %v275_v20  ;;  %v278_v24 = vld [vmem:[#allocation5 + $0x78] sm:$0xff]  ;;  %v232_v26 = vld [vmem:[%s1526_s29 + $0x8] sm:$0xff]  ;;  %v233_v28 = vld [vmem:[%s1526_s29 + $0x10] sm:$0xff] }
  0x5c   : > { %v1122_v25 = vpack.c.bf16 %v278_v24, %v277_v23  ;;  %v248_v27 = vld [vmem:[%s1526_s29 + $0x88] sm:$0xff]  ;;  %v249_v29 = vld [vmem:[%s1526_s29 + $0x90] sm:$0xff]  ;;  %v234_v30 = vld [vmem:[%s1526_s29 + $0x18] sm:$0xff] }
  0x5d   : > { %1101 = vmatpush3.bf16.msra.mxu0 %v1098_v5  ;;  %1135 = vmatpush3.bf16.msra.mxu1 %v1098_v5  ;;  %v250_v31 = vld [vmem:[%s1526_s29 + $0x98] sm:$0xff]  ;;  %v235_v32 = vld [vmem:[%s1526_s29 + $0x20] sm:$0xff]  ;;  %v236_v34 = vld [vmem:[%s1526_s29 + $0x28] sm:$0xff] }
  0x5e   : > { %1103 = vmatprep.subr.bf16.mxu0 %v1102_v8  ;;  %1128 = vmatprep.subr.bf16.mxu1 %v1102_v8  ;;  %v251_v33 = vld [vmem:[%s1526_s29 + $0xa0] sm:$0xff]  ;;  %v252_v35 = vld [vmem:[%s1526_s29 + $0xa8] sm:$0xff]  ;;  %v237_v36 = vld [vmem:[%s1526_s29 + $0x30] sm:$0xff] }
  0x5f   : > { %v253_v37 = vld [vmem:[%s1526_s29 + $0xb0] sm:$0xff]  ;;  %v238_v38 = vld [vmem:[%s1526_s29 + $0x38] sm:$0xff]  ;;  %v239_v40 = vld [vmem:[%s1526_s29 + $0x40] sm:$0xff] }
  0x60   : > { %v254_v39 = vld [vmem:[%s1526_s29 + $0xb8] sm:$0xff]  ;;  %v255_v41 = vld [vmem:[%s1526_s29 + $0xc0] sm:$0xff]  ;;  %v240_v42 = vld [vmem:[%s1526_s29 + $0x48] sm:$0xff] }
  0x61   : > { %1105 = vmatpush3.bf16.msra.mxu0 %v1102_v8  ;;  %1136 = vmatpush3.bf16.msra.mxu1 %v1102_v8  ;;  %v256_v43 = vld [vmem:[%s1526_s29 + $0xc8] sm:$0xff]  ;;  %v241_v44 = vld [vmem:[%s1526_s29 + $0x50] sm:$0xff]  ;;  %v242_v46 = vld [vmem:[%s1526_s29 + $0x58] sm:$0xff] }
  0x62   : > { %1107 = vmatprep.subr.bf16.mxu0 %v1106_v12  ;;  %1129 = vmatprep.subr.bf16.mxu1 %v1106_v12  ;;  %v257_v45 = vld [vmem:[%s1526_s29 + $0xd0] sm:$0xff]  ;;  %v258_v47 = vld [vmem:[%s1526_s29 + $0xd8] sm:$0xff]  ;;  %v243_v48 = vld [vmem:[%s1526_s29 + $0x60] sm:$0xff] }
  0x63   : > { %v259_v49 = vld [vmem:[%s1526_s29 + $0xe0] sm:$0xff]  ;;  %v244_v50 = vld [vmem:[%s1526_s29 + $0x68] sm:$0xff]  ;;  %v245_v52 = vld [vmem:[%s1526_s29 + $0x70] sm:$0xff] }
  0x64   : > { %v260_v51 = vld [vmem:[%s1526_s29 + $0xe8] sm:$0xff]  ;;  %v261_v53 = vld [vmem:[%s1526_s29 + $0xf0] sm:$0xff]  ;;  %v246_v54 = vld [vmem:[%s1526_s29 + $0x78] sm:$0xff] }
  0x65   : > { %1109 = vmatpush3.bf16.msra.mxu0 %v1106_v12  ;;  %1137 = vmatpush3.bf16.msra.mxu1 %v1106_v12  ;;  %v262_v55 = vld [vmem:[%s1526_s29 + $0xf8] sm:$0xff]  ;;  %s1868_s29 = scalar_lea.vmem [#allocation7], %s956_s20  ;;  %s965_s20 = sshll.u32 %s1396_s19, 12 }
  0x66   : > { %1111 = vmatprep.subr.bf16.mxu0 %v1110_v16  ;;  %1130 = vmatprep.subr.bf16.mxu1 %v1110_v16 }
  0x69   : > { %1113 = vmatpush3.bf16.msra.mxu0 %v1110_v16  ;;  %1138 = vmatpush3.bf16.msra.mxu1 %v1110_v16 }
  0x6a   : > { %1115 = vmatprep.subr.bf16.mxu0 %v1114_v19  ;;  %1131 = vmatprep.subr.bf16.mxu1 %v1114_v19 }
  0x6d   : > { %1117 = vmatpush3.bf16.msra.mxu0 %v1114_v19  ;;  %1139 = vmatpush3.bf16.msra.mxu1 %v1114_v19 }
  0x6e   : > { %1119 = vmatprep.subr.bf16.mxu0 %v1118_v22  ;;  %1132 = vmatprep.subr.bf16.mxu1 %v1118_v22 }
  0x71   : > { %1121 = vmatpush3.bf16.msra.mxu0 %v1118_v22  ;;  %1140 = vmatpush3.bf16.msra.mxu1 %v1118_v22 }
  0x72   : > { %1123 = vmatprep.subr.bf16.mxu0 %v1122_v25  ;;  %1133 = vmatprep.subr.bf16.mxu1 %v1122_v25 }
  0x75   : > { %1125 = vmatpush3.bf16.msra.mxu0 %v1122_v25  ;;  %1141 = vmatpush3.bf16.msra.mxu1 %v1122_v25 }
  0x78   : > { %1047 = vmatmul.mubr.f32.vlgmr.msra.gmra.mrb[0].mxu0 %v232_v26  ;;  %1071 = vmatmul.mubr.f32.vlgmr.msra.gmra.mrb[0].mxu1 %v248_v27 }
  0x79   : > { %1049 = vmatprep.mubr.f32.mxu0 %v233_v28  ;;  %1073 = vmatprep.mubr.f32.mxu1 %v249_v29 }
  0x7c   : > { %1050 = vmatmul.mubr.f32.gmra.mrb[2].mxu0 %v234_v30  ;;  %1074 = vmatmul.mubr.f32.gmra.mrb[2].mxu1 %v250_v31 }
  0x7d   : > { %1052 = vmatprep.mubr.f32.mxu0 %v235_v32  ;;  %1076 = vmatprep.mubr.f32.mxu1 %v251_v33 }
  0x80   : > { %1053 = vmatmul.mubr.f32.gmra.mrb[4].mxu0 %v236_v34  ;;  %1077 = vmatmul.mubr.f32.gmra.mrb[4].mxu1 %v252_v35 }
  0x81   : > { %1055 = vmatprep.mubr.f32.mxu0 %v237_v36  ;;  %1079 = vmatprep.mubr.f32.mxu1 %v253_v37 }
  0x84   : > { %1056 = vmatmul.mubr.f32.gmra.mrb[6].mxu0 %v238_v38  ;;  %1080 = vmatmul.mubr.f32.gmra.mrb[6].mxu1 %v254_v39 }
  0x85   : > { %1058 = vmatprep.mubr.f32.mxu0 %v239_v40  ;;  %1082 = vmatprep.mubr.f32.mxu1 %v255_v41 }
  0x88   : > { %1059 = vmatmul.mubr.f32.gmra.mrb[8].mxu0 %v240_v42  ;;  %1083 = vmatmul.mubr.f32.gmra.mrb[8].mxu1 %v256_v43 }
  0x89   : > { %1061 = vmatprep.mubr.f32.mxu0 %v241_v44  ;;  %1085 = vmatprep.mubr.f32.mxu1 %v257_v45 }
  0x8c   : > { %1062 = vmatmul.mubr.f32.gmra.mrb[10].mxu0 %v242_v46  ;;  %1086 = vmatmul.mubr.f32.gmra.mrb[10].mxu1 %v258_v47 }
  0x8d   : > { %1064 = vmatprep.mubr.f32.mxu0 %v243_v48  ;;  %1088 = vmatprep.mubr.f32.mxu1 %v259_v49 }
  0x90   : > { %1065 = vmatmul.mubr.f32.gmra.mrb[12].mxu0 %v244_v50  ;;  %1089 = vmatmul.mubr.f32.gmra.mrb[12].mxu1 %v260_v51 }
  0x91   : > { %1067 = vmatprep.mubr.f32.mxu0 %v245_v52  ;;  %1091 = vmatprep.mubr.f32.mxu1 %v261_v53 }
  0x94   : > { %1068 = vmatmul.mubr.f32.gmra.mrb[14].mxu0 %v246_v54  ;;  %1092 = vmatmul.mubr.f32.gmra.mrb[14].mxu1 %v262_v55 }
 0x14b   : > { %v1568_v56 = vpop.f32.mrb[0].mxu0  ;;  %v1570_v57 = vpop.f32.mrb[0].mxu1 }
 0x14c   : > { %v542_v58 = vmul.f32 %v1568_v56, %v1568_v56  ;;  %v1574_v59 = vpop.f32.mrb[1].mxu0  ;;  %v1576_v60 = vpop.f32.mrb[1].mxu1 }
 0x14d   : > { %v504_v61 = vadd.f32 %v1568_v56, %v1574_v59  ;;  %v541_v62 = vmul.f32 %v1574_v59, %v1574_v59 }
 0x14f   : > { %v573_v63 = vadd.f32 %v542_v58, %v541_v62  ;;  %v1582_v0 = vpop.f32.mrb[2].mxu0  ;;  %v1584_v1 = vpop.f32.mrb[2].mxu1 }
 0x150   : > { %v1586_v2 = vpop.f32.mrb[3].mxu0  ;;  %v1588_v3 = vpop.f32.mrb[3].mxu1  ;;  %v544_v6 = vmul.f32 %v1582_v0, %v1582_v0 }
 0x151   : > { %v505_v4 = vadd.f32 %v504_v61, %v1586_v2  ;;  %v543_v5 = vmul.f32 %v1586_v2, %v1586_v2 }
 0x153   : > { %v574_v7 = vadd.f32 %v573_v63, %v543_v5  ;;  %v1595_v8 = vpop.f32.mrb[4].mxu0  ;;  %v506_v9 = vadd.f32 %v1582_v0, %v505_v4  ;;  %v1598_v10 = vpop.f32.mrb[4].mxu1 }
 0x154   : > { %v1600_v11 = vpop.f32.mrb[5].mxu0  ;;  %v1602_v12 = vpop.f32.mrb[5].mxu1  ;;  %v546_v16 = vmul.f32 %v1595_v8, %v1595_v8 }
 0x155   : > { %v507_v13 = vadd.f32 %v506_v9, %v1600_v11  ;;  %v545_v14 = vmul.f32 %v1600_v11, %v1600_v11  ;;  %v575_v15 = vadd.f32 %v574_v7, %v544_v6 }
 0x157   : > { %v576_v17 = vadd.f32 %v575_v15, %v545_v14  ;;  %v1609_v18 = vpop.f32.mrb[6].mxu0  ;;  %v508_v19 = vadd.f32 %v1595_v8, %v507_v13  ;;  %v1612_v20 = vpop.f32.mrb[6].mxu1 }
 0x158   : > { %v1614_v21 = vpop.f32.mrb[7].mxu0  ;;  %v1616_v22 = vpop.f32.mrb[7].mxu1  ;;  %v548_v26 = vmul.f32 %v1609_v18, %v1609_v18 }
 0x159   : > { %v509_v23 = vadd.f32 %v508_v19, %v1614_v21  ;;  %v547_v24 = vmul.f32 %v1614_v21, %v1614_v21  ;;  %v577_v25 = vadd.f32 %v576_v17, %v546_v16  ;;  %v557_v17 = vmul.f32 %v1576_v60, %v1576_v60 }
 0x15b   : > { %v578_v27 = vadd.f32 %v577_v25, %v547_v24  ;;  %v1623_v28 = vpop.f32.mrb[8].mxu0  ;;  %v510_v29 = vadd.f32 %v1609_v18, %v509_v23  ;;  %v1626_v30 = vpop.f32.mrb[8].mxu1  ;;  %v558_v24 = vmul.f32 %v1570_v57, %v1570_v57 }
 0x15c   : > { %v1628_v31 = vpop.f32.mrb[9].mxu0  ;;  %v1630_v32 = vpop.f32.mrb[9].mxu1  ;;  %v550_v36 = vmul.f32 %v1623_v28, %v1623_v28 }
 0x15d   : > { %v511_v33 = vadd.f32 %v510_v29, %v1628_v31  ;;  %v549_v34 = vmul.f32 %v1628_v31, %v1628_v31  ;;  %v579_v35 = vadd.f32 %v578_v27, %v548_v26  ;;  %v559_v27 = vmul.f32 %v1588_v3, %v1588_v3 }
 0x15f   : > { %v580_v37 = vadd.f32 %v579_v35, %v549_v34  ;;  %v1637_v38 = vpop.f32.mrb[10].mxu0  ;;  %v512_v39 = vadd.f32 %v1623_v28, %v511_v33  ;;  %v1640_v40 = vpop.f32.mrb[10].mxu1  ;;  %v560_v34 = vmul.f32 %v1584_v1, %v1584_v1 }
 0x160   : > { %v1642_v41 = vpop.f32.mrb[11].mxu0  ;;  %v1644_v42 = vpop.f32.mrb[11].mxu1  ;;  %v552_v46 = vmul.f32 %v1637_v38, %v1637_v38 }
 0x161   : > { %v513_v43 = vadd.f32 %v512_v39, %v1642_v41  ;;  %v551_v44 = vmul.f32 %v1642_v41, %v1642_v41  ;;  %v581_v45 = vadd.f32 %v580_v37, %v550_v36  ;;  %v561_v37 = vmul.f32 %v1602_v12, %v1602_v12 }
 0x163   : > { %v582_v47 = vadd.f32 %v581_v45, %v551_v44  ;;  %v1651_v48 = vpop.f32.mrb[12].mxu0  ;;  %v514_v49 = vadd.f32 %v1637_v38, %v513_v43  ;;  %v1654_v50 = vpop.f32.mrb[12].mxu1  ;;  %v562_v44 = vmul.f32 %v1598_v10, %v1598_v10 }
 0x164   : > { %v1656_v51 = vpop.f32.mrb[13].mxu0  ;;  %v1658_v52 = vpop.f32.mrb[13].mxu1  ;;  %v554_v58 = vmul.f32 %v1651_v48, %v1651_v48 }
 0x165   : > { %v515_v53 = vadd.f32 %v514_v49, %v1656_v51  ;;  %v553_v54 = vmul.f32 %v1656_v51, %v1656_v51  ;;  %v583_v55 = vadd.f32 %v582_v47, %v552_v46  ;;  %v563_v47 = vmul.f32 %v1616_v22, %v1616_v22 }
 0x167   : > { %v584_v61 = vadd.f32 %v583_v55, %v553_v54  ;;  %v1665_v62 = vpop.f32.mrb[14].mxu0  ;;  %v516_v63 = vadd.f32 %v1651_v48, %v515_v53  ;;  %v1668_v4 = vpop.f32.mrb[14].mxu1  ;;  %v564_v54 = vmul.f32 %v1612_v20, %v1612_v20 }
 0x168   : > { %v1670_v5 = vpop.f32.mrb[15].mxu0  ;;  %v1672_v6 = vpop.f32.mrb[15].mxu1  ;;  %v556_v14 = vmul.f32 %v1665_v62, %v1665_v62 }
 0x169   : > { %v517_v7 = vadd.f32 %v516_v63, %v1670_v5  ;;  %v555_v9 = vmul.f32 %v1670_v5, %v1670_v5  ;;  %v585_v13 = vadd.f32 %v584_v61, %v554_v58  ;;  %v565_v61 = vmul.f32 %v1630_v32, %v1630_v32 }
 0x16b   : > { %v518_v15 = vadd.f32 %v1665_v62, %v517_v7  ;;  %v586_v16 = vadd.f32 %v585_v13, %v555_v9  ;;  %v566_v9 = vmul.f32 %v1626_v30, %v1626_v30 }
 0x16d   : > { %v587_v19 = vadd.f32 %v586_v16, %v556_v14  ;;  %v519_v23 = vadd.f32 %v518_v15, %v1576_v60  ;;  %v567_v15 = vmul.f32 %v1644_v42, %v1644_v42 }
 0x16f   : > { %v588_v25 = vadd.f32 %v587_v19, %v557_v17  ;;  %v520_v26 = vadd.f32 %v1570_v57, %v519_v23  ;;  %v568_v19 = vmul.f32 %v1640_v40, %v1640_v40 }
 0x171   : > { %v521_v29 = vadd.f32 %v520_v26, %v1588_v3  ;;  %v589_v33 = vadd.f32 %v588_v25, %v558_v24  ;;  %v569_v25 = vmul.f32 %v1658_v52, %v1658_v52 }
 0x173   : > { %v590_v35 = vadd.f32 %v589_v33, %v559_v27  ;;  %v522_v36 = vadd.f32 %v1584_v1, %v521_v29  ;;  %v570_v29 = vmul.f32 %v1654_v50, %v1654_v50 }
 0x175   : > { %v523_v39 = vadd.f32 %v522_v36, %v1602_v12  ;;  %v591_v43 = vadd.f32 %v590_v35, %v560_v34  ;;  %v571_v35 = vmul.f32 %v1672_v6, %v1672_v6 }
 0x177   : > { %v592_v45 = vadd.f32 %v591_v43, %v561_v37  ;;  %v524_v46 = vadd.f32 %v1598_v10, %v523_v39  ;;  %v572_v39 = vmul.f32 %v1668_v4, %v1668_v4 }
 0x179   : > { %v525_v49 = vadd.f32 %v524_v46, %v1616_v22  ;;  %v593_v53 = vadd.f32 %v592_v45, %v562_v44 }
 0x17b   : > { %v594_v55 = vadd.f32 %v593_v53, %v563_v47  ;;  %v526_v58 = vadd.f32 %v1612_v20, %v525_v49 }
 0x17d   : > { %v527_v63 = vadd.f32 %v526_v58, %v1630_v32  ;;  %v595_v7 = vadd.f32 %v594_v55, %v564_v54 }
 0x17f   : > { %v596_v13 = vadd.f32 %v595_v7, %v565_v61  ;;  %v528_v14 = vadd.f32 %v1626_v30, %v527_v63 }
 0x181   : > { %v529_v16 = vadd.f32 %v528_v14, %v1644_v42  ;;  %v597_v17 = vadd.f32 %v596_v13, %v566_v9 }
 0x183   : > { %v598_v23 = vadd.f32 %v597_v17, %v567_v15  ;;  %v530_v24 = vadd.f32 %v1640_v40, %v529_v16 }
 0x185   : > { %v531_v26 = vadd.f32 %v530_v24, %v1658_v52  ;;  %v599_v27 = vadd.f32 %v598_v23, %v568_v19 }
 0x187   : > { %v600_v33 = vadd.f32 %v599_v27, %v569_v25  ;;  %v532_v34 = vadd.f32 %v1654_v50, %v531_v26 }
 0x189   : > { %v533_v36 = vadd.f32 %v532_v34, %v1672_v6  ;;  %v601_v37 = vadd.f32 %v600_v33, %v570_v29 }
 0x18b   : > { %v534_v43 = vadd.f32 %v1668_v4, %v533_v36  ;;  %v602_v44 = vadd.f32 %v601_v37, %v571_v35 }
 0x18d   : > { %v535_v45 = vrot.slane %v534_v43, 4  ;;  %v603_v46 = vadd.f32 %v602_v44, %v572_v39  ;;  %v648_v44 = vlaneseq }
 0x18f   : > { %v604_v47 = vrot.slane %v603_v46, 4  ;;  %v536_v49 = vadd.f32 %v535_v45, %v534_v43  ;;  %v649_v45 = vshrl.u32 %v648_v44, 7 }
 0x191   : > { %v537_v53 = vrot.slane %v536_v49, 2  ;;  %v605_v54 = vadd.f32 %v604_v47, %v603_v46  ;;  %v640_v46 = vld [vmem:[%s2073_s2] sm:$0x1]  ;;  %v650_v47 = vsub.s32 0, %v649_v45 }
 0x193   : > { %v538_v55 = vadd.f32 %v537_v53, %v536_v49  ;;  %v606_v58 = vrot.slane %v605_v54, 2 }
 0x195   : > { %v539_v61 = vrot.slane %v538_v55, 1  ;;  %v607_v63 = vadd.f32 %v606_v58, %v605_v54 }
 0x197   : > { %v540_v7 = vadd.f32 %v539_v61, %v538_v55  ;;  %v608_v9 = vrot.slane %v607_v63, 1  ;;  %v643_v55 = vld [vmem:[%s2074_s3] sm:$0x1] }
 0x199   : > { %v611_v13 = vsel %vm610_vm0, %v540_v7, 0.0  ;;  %v609_v14 = vadd.f32 %v608_v9, %v607_v63 }
 0x19a   : > { %612 = vadd.xlane.f32.xlu0 %v611_v13 }
 0x19b   : > { %v622_v15 = vsel %vm610_vm0, %v609_v14, 0.0 }
 0x19e   : > { %623 = vadd.xlane.f32.xlu0 %v622_v15 }
 0x227   : > { %v613_v16 = vpop.xlane.xlu0 %612 }
 0x228   : > { %v614_v17 = vrot.slane %v613_v16, 4 }
 0x22a   : > { %v615_v19 = vadd.f32 %v614_v17, %v613_v16 }
 0x22b   : > { %v624_v23 = vpop.xlane.xlu0 %623 }
 0x22c   : > { %v616_v24 = vrot.slane %v615_v19, 2  ;;  %v625_v25 = vrot.slane %v624_v23, 4 }
 0x22e   : > { %v626_v26 = vadd.f32 %v625_v25, %v624_v23  ;;  %v617_v27 = vadd.f32 %v616_v24, %v615_v19 }
 0x230   : > { %v627_v29 = vrot.slane %v626_v26, 2  ;;  %v618_v33 = vrot.slane %v617_v27, 1 }
 0x232   : > { %v628_v34 = vadd.f32 %v627_v29, %v626_v26  ;;  %v619_v35 = vadd.f32 %v618_v33, %v617_v27 }
 0x234   : > { %1142 = vpush %v619_v35  ;;  %v629_v36 = vrot.slane %v628_v34, 1 }
 0x236   : > { %v630_v37 = vadd.f32 %v629_v36, %v628_v34 }
 0x238   : > { %1144 = vpush %v630_v37 }
 0x265   : > { %s1143_s21 = spop %1142 }
 0x266   : > { %s621_s23 = smul.f32 0.00048828125, %s1143_s21  ;;  %s865_s21 = sshll.u32 %s1868_s29, 4  ;;  %s1995_s21 = int_to_ptr.vmem [resolvable:$true] %s865_s21 }
 0x268   : > { %s633_s12 = smul.f32 %s621_s23, %s621_s23  ;;  %v644_v54 = vstv %s621_s23 }
 0x269   : > { %s1145_s13 = spop %1144 }
 0x26a   : > { %s632_s9 = smul.f32 0.00048828125, %s1145_s13  ;;  %s852_s13 = scalar_lea.sflag [#allocation4], %s1520_s11 }
 0x26c   : > { %s634_s28 = ssub.f32 %s632_s9, %s633_s12  ;;  %s1993_s12 = scalar_lea.hbm %s2075_s4, %s965_s20 }
 0x26d   : > { %s1270_s9 = scalar_lea.vmem %s1995_s21, 4096 }
 0x26e   : > { %s635_s6 = smax.f32 %s1346_s10, %s634_s28  ;;  %p1271_p4 = scmp.ne.s32.totalorder %s1995_s21, %s1270_s9 }
 0x26f   : > { %s636_s7 = sadd.f32 1e-05, %s635_s6  ;;  %s1347_s28 = smov [#allocation7]  }
 0x270   : > { %p1272_p6 = pnand %p1271_p4, %p1469_p12  ;;  %s1274_s10 = sshll.u32 %s1347_s28, 4  ;;  %s1275_s10 = int_to_ptr.vmem [resolvable:$false] %s1274_s10 }
 0x271   : > { %v637_v39 = vstv %s636_s7  ;;  %s1276_s6 = scalar_lea.vmem %s1275_s10, 8192  ;;  %p1277_p10 = scmp.lt.s32.totalorder %s1995_s21, %s1275_s10 }
 0x272   : > { %1210 = vrsqrt.f32 %v637_v39  ;;  %p1273_p8 = pneg %p1272_p6  ;;  %p1278_p13 = scmp.lt.s32.totalorder %s1276_s6, %s1270_s9 }
 0x274   : > { %p1279_p3 = por %p1278_p13, %p1277_p10 }
 0x276   : > { %p1280_p7 = pnand %p1279_p3, %p1273_p8 }
 0x27c   : > { %v1211_v43 = vpop.eup %1210 }
 0x27d   : > { %1146 = vpush %v1211_v43 }
 0x2ae   : > { %s1147_s25 = spop %1146 }
 0x2af   : > { %v641_v49 = vstv %s1147_s25 }
 0x2b0   : > { %v642_v53 = vmul.f32 %v641_v49, %v640_v46 }
 0x2b2   : > { %v645_v58 = vmul.f32 %v644_v54, %v642_v53  ;;  %v651_v61 = vrot.slane %v642_v53, %v650_v47 }
 0x2b4   : > { %v646_v63 = vsub.f32 %v643_v55, %v645_v58  ;;  %v653_v7 = vmul.f32 %v651_v61, %v1574_v59  ;;  %v654_v9 = vmul.f32 %v1568_v56, %v651_v61  ;;  %v655_v13 = vmul.f32 %v651_v61, %v1586_v2 }
 0x2b5   : > { %v656_v14 = vmul.f32 %v1582_v0, %v651_v61  ;;  %v657_v15 = vmul.f32 %v651_v61, %v1600_v11  ;;  %v658_v16 = vmul.f32 %v1595_v8, %v651_v61  ;;  %v659_v17 = vmul.f32 %v651_v61, %v1614_v21 }
 0x2b6   : > { %v689_v19 = vrot.slane %v646_v63, %v650_v47  ;;  %v660_v23 = vmul.f32 %v1609_v18, %v651_v61  ;;  %v661_v24 = vmul.f32 %v651_v61, %v1628_v31  ;;  %v662_v25 = vmul.f32 %v1623_v28, %v651_v61 }
 0x2b7   : > { %v663_v59 = vmul.f32 %v651_v61, %v1642_v41  ;;  %v664_v56 = vmul.f32 %v1637_v38, %v651_v61  ;;  %v665_v2 = vmul.f32 %v651_v61, %v1656_v51  ;;  %v666_v0 = vmul.f32 %v1651_v48, %v651_v61 }
 0x2b8   : > { %v667_v11 = vmul.f32 %v651_v61, %v1670_v5  ;;  %v668_v8 = vmul.f32 %v1665_v62, %v651_v61  ;;  %v669_v21 = vmul.f32 %v651_v61, %v1576_v60  ;;  %v670_v18 = vmul.f32 %v1570_v57, %v651_v61 }
 0x2b9   : > { %v671_v31 = vmul.f32 %v651_v61, %v1588_v3  ;;  %v672_v28 = vmul.f32 %v1584_v1, %v651_v61  ;;  %v673_v41 = vmul.f32 %v651_v61, %v1602_v12  ;;  %v674_v38 = vmul.f32 %v1598_v10, %v651_v61 }
 0x2ba   : > { %v675_v51 = vmul.f32 %v651_v61, %v1616_v22  ;;  %v676_v48 = vmul.f32 %v1612_v20, %v651_v61  ;;  %v677_v5 = vmul.f32 %v651_v61, %v1630_v32  ;;  %v678_v62 = vmul.f32 %v1626_v30, %v651_v61 }
 0x2bb   : > { %v679_v60 = vmul.f32 %v651_v61, %v1644_v42  ;;  %v680_v57 = vmul.f32 %v1640_v40, %v651_v61  ;;  %v681_v3 = vmul.f32 %v651_v61, %v1658_v52  ;;  %v682_v1 = vmul.f32 %v1654_v50, %v651_v61 }
 0x2bc   : > { %v683_v12 = vmul.f32 %v651_v61, %v1672_v6  ;;  %v684_v10 = vmul.f32 %v1668_v4, %v651_v61  ;;  %v691_v26 = vadd.f32 %v689_v19, %v653_v7  ;;  %v1766_v22 = vadd.f32 %v689_v19, %v654_v9 }
 0x2bd   : > { %v1768_v20 = vadd.f32 %v689_v19, %v655_v13  ;;  %v1770_v32 = vadd.f32 %v689_v19, %v656_v14  ;;  %v1772_v30 = vadd.f32 %v689_v19, %v657_v15  ;;  %v1774_v42 = vadd.f32 %v689_v19, %v658_v16 }
 0x2be   : > { %v1776_v40 = vadd.f32 %v689_v19, %v659_v17  ;;  %v1778_v52 = vadd.f32 %v689_v19, %v660_v23  ;;  %v1780_v50 = vadd.f32 %v689_v19, %v661_v24  ;;  %v1782_v6 = vadd.f32 %v689_v19, %v662_v25 }
 0x2bf   : > { %v1784_v4 = vadd.f32 %v689_v19, %v663_v59  ;;  %v1786_v27 = vadd.f32 %v689_v19, %v664_v56  ;;  %v1788_v29 = vadd.f32 %v689_v19, %v665_v2  ;;  %v1790_v33 = vadd.f32 %v689_v19, %v666_v0 }
 0x2c0   : > { %v1792_v34 = vadd.f32 %v689_v19, %v667_v11  ;;  %v1794_v35 = vadd.f32 %v689_v19, %v668_v8  ;;  %v1796_v36 = vadd.f32 %v689_v19, %v669_v21  ;;  %v1798_v37 = vadd.f32 %v689_v19, %v670_v18 }
 0x2c1   : > { %v1800_v39 = vadd.f32 %v689_v19, %v671_v31  ;;  %v1802_v43 = vadd.f32 %v689_v19, %v672_v28  ;;  %v1804_v44 = vadd.f32 %v689_v19, %v673_v41  ;;  %v1806_v45 = vadd.f32 %v689_v19, %v674_v38 }
 0x2c2   : > { %v1808_v46 = vadd.f32 %v689_v19, %v675_v51  ;;  %v1810_v47 = vadd.f32 %v689_v19, %v676_v48  ;;  %v1812_v49 = vadd.f32 %v689_v19, %v677_v5  ;;  %v1814_v53 = vadd.f32 %v689_v19, %v678_v62 }
 0x2c3   : > { %v1816_v54 = vadd.f32 %v689_v19, %v679_v60  ;;  %v1818_v55 = vadd.f32 %v689_v19, %v680_v57  ;;  %v1820_v58 = vadd.f32 %v689_v19, %v681_v3  ;;  %v1822_v61 = vadd.f32 %v689_v19, %v682_v1 }
 0x2c4   : > { %v1824_v63 = vadd.f32 %v689_v19, %v683_v12  ;;  %v1826_v7 = vadd.f32 %v689_v19, %v684_v10  ;;  %vm723_vm1 = vcmp.ge.f32.partialorder %v691_v26, 0.0  ;;  %vm724_vm2 = vcmp.ge.f32.partialorder %v1766_v22, 0.0 }
 0x2c5   : > { %vm725_vm3 = vcmp.ge.f32.partialorder %v1768_v20, 0.0  ;;  %vm726_vm4 = vcmp.ge.f32.partialorder %v1770_v32, 0.0  ;;  %vm727_vm5 = vcmp.ge.f32.partialorder %v1772_v30, 0.0  ;;  %vm728_vm6 = vcmp.ge.f32.partialorder %v1774_v42, 0.0 }
 0x2c6   : > { %vm729_vm7 = vcmp.ge.f32.partialorder %v1776_v40, 0.0  ;;  %vm731_vm9 = vcmp.ge.f32.partialorder %v1780_v50, 0.0  ;;  %vm732_vm10 = vcmp.ge.f32.partialorder %v1782_v6, 0.0  ;;  %v755_v9 = vmul.f32 0.2, %v691_v26 }
 0x2c7   : > { %v756_v13 = vmul.f32 0.2, %v1766_v22  ;;  %vm737_vm15 = vcmp.ge.f32.partialorder %v1792_v34, 0.0  ;;  %v757_v14 = vmul.f32 0.2, %v1768_v20  ;;  %vm742_vm11 = vcmp.ge.f32.partialorder %v1802_v43, 0.0 }
 0x2c8   : > { %v758_v15 = vmul.f32 0.2, %v1770_v32  ;;  %v759_v16 = vmul.f32 0.2, %v1772_v30  ;;  %vm743_vm14 = vcmp.ge.f32.partialorder %v1804_v44, 0.0  ;;  %v787_v24 = vsel %vm723_vm1, %v691_v26, %v755_v9 }
 0x2c9   : > { %v760_v17 = vmul.f32 0.2, %v1774_v42  ;;  %v761_v19 = vmul.f32 0.2, %v1776_v40  ;;  %v762_v23 = vmul.f32 0.2, %v1778_v52  ;;  %v788_v2 = vsel %vm724_vm2, %v1766_v22, %v756_v13  ;;  %819 = vst [vmem:[%s1868_s29] sm:$0xff] %v787_v24 }
 0x2ca   : > { %vm744_vm8 = vcmp.ge.f32.partialorder %v1806_v45, 0.0  ;;  %v763_v25 = vmul.f32 0.2, %v1780_v50  ;;  %v764_v59 = vmul.f32 0.2, %v1782_v6  ;;  %vm748_vm1 = vcmp.ge.f32.partialorder %v1814_v53, 0.0 }
 0x2cb   : > { %v765_v56 = vmul.f32 0.2, %v1784_v4  ;;  %vm751_vm0 = vcmp.ge.f32.partialorder %v1820_v58, 0.0  ;;  %v766_v0 = vmul.f32 0.2, %v1786_v27  ;;  %v789_v21 = vsel %vm725_vm3, %v1768_v20, %v757_v14  ;;  %820 = vst [vmem:[%s1868_s29 + $0x8] sm:$0xff] %v788_v2 }
 0x2cc   : > { %v767_v11 = vmul.f32 0.2, %v1788_v29  ;;  %v768_v8 = vmul.f32 0.2, %v1790_v33  ;;  %vm752_vm2 = vcmp.ge.f32.partialorder %v1822_v61, 0.0  ;;  %vm753_vm13 = vcmp.ge.f32.partialorder %v1824_v63, 0.0 }
 0x2cd   : > { %vm754_vm12 = vcmp.ge.f32.partialorder %v1826_v7, 0.0  ;;  %v769_v18 = vmul.f32 0.2, %v1792_v34  ;;  %v770_v31 = vmul.f32 0.2, %v1794_v35  ;;  %v790_v41 = vsel %vm726_vm4, %v1770_v32, %v758_v15  ;;  %821 = vst [vmem:[%s1868_s29 + $0x10] sm:$0xff] %v789_v21 }
 0x2ce   : > { %v771_v28 = vmul.f32 0.2, %v1796_v36  ;;  %v772_v38 = vmul.f32 0.2, %v1798_v37  ;;  %v773_v51 = vmul.f32 0.2, %v1800_v39  ;;  %v791_v5 = vsel %vm727_vm5, %v1772_v30, %v759_v16 }
 0x2cf   : > { %v774_v48 = vmul.f32 0.2, %v1802_v43  ;;  %822 = vst [vmem:[%s1868_s29 + $0x18] sm:$0xff] %v790_v41  ;;  %v775_v62 = vmul.f32 0.2, %v1804_v44  ;;  %v792_v3 = vsel %vm728_vm6, %v1774_v42, %v760_v17  ;;  %823 = vst [vmem:[%s1868_s29 + $0x20] sm:$0xff] %v791_v5  ;;  %v793_v26 = vsel %vm729_vm7, %v1776_v40, %v761_v19 }
 0x2d0   : > { %v776_v60 = vmul.f32 0.2, %v1806_v45  ;;  %v777_v57 = vmul.f32 0.2, %v1808_v46  ;;  %v778_v1 = vmul.f32 0.2, %v1810_v47  ;;  %v795_v13 = vsel %vm731_vm9, %v1780_v50, %v763_v25 }
 0x2d1   : > { %v779_v12 = vmul.f32 0.2, %v1812_v49  ;;  %v780_v10 = vmul.f32 0.2, %v1814_v53  ;;  %824 = vst [vmem:[%s1868_s29 + $0x28] sm:$0xff] %v792_v3  ;;  %vm2090_vm3 = vcmp.ge.f32.partialorder %v1778_v52, 0.0 }
 0x2d2   : > { %v781_v22 = vmul.f32 0.2, %v1816_v54  ;;  %v782_v20 = vmul.f32 0.2, %v1818_v55  ;;  %v783_v32 = vmul.f32 0.2, %v1820_v58  ;;  %v794_v30 = vsel %vm2090_vm3, %v1778_v52, %v762_v23 }
 0x2d3   : > { %825 = vst [vmem:[%s1868_s29 + $0x30] sm:$0xff] %v793_v26  ;;  %v784_v42 = vmul.f32 0.2, %v1822_v61  ;;  %v785_v40 = vmul.f32 0.2, %v1824_v63  ;;  %826 = vst [vmem:[%s1868_s29 + $0x38] sm:$0xff] %v794_v30  ;;  %v796_v52 = vsel %vm732_vm10, %v1782_v6, %v764_v59  ;;  %v801_v6 = vsel %vm737_vm15, %v1792_v34, %v769_v18 }
 0x2d4   : > { %v786_v9 = vmul.f32 0.2, %v1826_v7  ;;  %vm2091_vm4 = vcmp.ge.f32.partialorder %v1784_v4, 0.0  ;;  %vm2092_vm5 = vcmp.ge.f32.partialorder %v1786_v27, 0.0  ;;  %vm2093_vm6 = vcmp.ge.f32.partialorder %v1788_v29, 0.0  ;;  %827 = vst [vmem:[%s1868_s29 + $0x40] sm:$0xff] %v795_v13 }
 0x2d5   : > { %v797_v14 = vsel %vm2091_vm4, %v1784_v4, %v765_v56  ;;  %v798_v15 = vsel %vm2092_vm5, %v1786_v27, %v766_v0  ;;  %v799_v16 = vsel %vm2093_vm6, %v1788_v29, %v767_v11  ;;  %vm2094_vm7 = vcmp.ge.f32.partialorder %v1790_v33, 0.0  ;;  %828 = vst [vmem:[%s1868_s29 + $0x48] sm:$0xff] %v796_v52  ;;  %833 = vst [vmem:[%s1868_s29 + $0x70] sm:$0xff] %v801_v6 }
 0x2d6   : > { %v800_v50 = vsel %vm2094_vm7, %v1790_v33, %v768_v8  ;;  %vm2095_vm9 = vcmp.ge.f32.partialorder %v1794_v35, 0.0  ;;  %vm2096_vm10 = vcmp.ge.f32.partialorder %v1796_v36, 0.0  ;;  %829 = vst [vmem:[%s1868_s29 + $0x50] sm:$0xff] %v797_v14  ;;  %830 = vst [vmem:[%s1868_s29 + $0x58] sm:$0xff] %v798_v15  ;;  %vm2097_vm3 = vcmp.ge.f32.partialorder %v1798_v37, 0.0 }
 0x2d7   : > { %v802_v4 = vsel %vm2095_vm9, %v1794_v35, %v770_v31  ;;  %v803_v27 = vsel %vm2096_vm10, %v1796_v36, %v771_v28  ;;  %831 = vst [vmem:[%s1868_s29 + $0x60] sm:$0xff] %v799_v16  ;;  %v804_v29 = vsel %vm2097_vm3, %v1798_v37, %v772_v38  ;;  %vm2098_vm15 = vcmp.ge.f32.partialorder %v1800_v39, 0.0  ;;  %832 = vst [vmem:[%s1868_s29 + $0x68] sm:$0xff] %v800_v50 }
 0x2d8   : > { %v805_v33 = vsel %vm2098_vm15, %v1800_v39, %v773_v51  ;;  %v806_v34 = vsel %vm742_vm11, %v1802_v43, %v774_v48  ;;  %v807_v35 = vsel %vm743_vm14, %v1804_v44, %v775_v62  ;;  %834 = vst [vmem:[%s1868_s29 + $0x78] sm:$0xff] %v802_v4  ;;  %835 = vst [vmem:[%s1868_s29 + $0x80] sm:$0xff] %v803_v27  ;;  %vm2099_vm4 = vcmp.ge.f32.partialorder %v1808_v46, 0.0 }
 0x2d9   : > { %v808_v36 = vsel %vm744_vm8, %v1806_v45, %v776_v60  ;;  %v809_v37 = vsel %vm2099_vm4, %v1808_v46, %v777_v57  ;;  %vm2100_vm11 = vcmp.ge.f32.partialorder %v1810_v47, 0.0  ;;  %vm2101_vm14 = vcmp.ge.f32.partialorder %v1812_v49, 0.0  ;;  %836 = vst [vmem:[%s1868_s29 + $0x88] sm:$0xff] %v804_v29  ;;  %837 = vst [vmem:[%s1868_s29 + $0x90] sm:$0xff] %v805_v33 }
 0x2da   : > { %v810_v39 = vsel %vm2100_vm11, %v1810_v47, %v778_v1  ;;  %v811_v43 = vsel %vm2101_vm14, %v1812_v49, %v779_v12  ;;  %838 = vst [vmem:[%s1868_s29 + $0x98] sm:$0xff] %v806_v34  ;;  %839 = vst [vmem:[%s1868_s29 + $0xa0] sm:$0xff] %v807_v35  ;;  %v812_v44 = vsel %vm748_vm1, %v1814_v53, %v780_v10  ;;  %vm2102_vm8 = vcmp.ge.f32.partialorder %v1816_v54, 0.0 }
 0x2db   : > { %v813_v45 = vsel %vm2102_vm8, %v1816_v54, %v781_v22  ;;  %vm2103_vm5 = vcmp.ge.f32.partialorder %v1818_v55, 0.0  ;;  %v815_v47 = vsel %vm751_vm0, %v1820_v58, %v783_v32  ;;  %840 = vst [vmem:[%s1868_s29 + $0xa8] sm:$0xff] %v808_v36  ;;  %841 = vst [vmem:[%s1868_s29 + $0xb0] sm:$0xff] %v809_v37  ;;  %v816_v49 = vsel %vm752_vm2, %v1822_v61, %v784_v42 }
 0x2dc   : > { %v814_v46 = vsel %vm2103_vm5, %v1818_v55, %v782_v20  ;;  %842 = vst [vmem:[%s1868_s29 + $0xb8] sm:$0xff] %v810_v39  ;;  %843 = vst [vmem:[%s1868_s29 + $0xc0] sm:$0xff] %v811_v43  ;;  %v817_v53 = vsel %vm753_vm13, %v1824_v63, %v785_v40  ;;  %v818_v54 = vsel %vm754_vm12, %v1826_v7, %v786_v9 }
 0x2dd   : > { %844 = vst [vmem:[%s1868_s29 + $0xc8] sm:$0xff] %v812_v44  ;;  %845 = vst [vmem:[%s1868_s29 + $0xd0] sm:$0xff] %v813_v45 }
 0x2de   : > { %846 = vst [vmem:[%s1868_s29 + $0xd8] sm:$0xff] %v814_v46  ;;  %847 = vst [vmem:[%s1868_s29 + $0xe0] sm:$0xff] %v815_v47 }
 0x2df   : > { %848 = vst [vmem:[%s1868_s29 + $0xe8] sm:$0xff] %v816_v49  ;;  %849 = vst [vmem:[%s1868_s29 + $0xf0] sm:$0xff] %v817_v53 }
 0x2e0   : > { %850 = vst [vmem:[%s1868_s29 + $0xf8] sm:$0xff] %v818_v54 }
 0x2e1   : > { %1283 = shalt.err (!%p1280_p7)
}
 0x2e2   : > { %s1284_s7 = scalar_lea.hbm %s1993_s12, 4096  ;;  %s1288_s25 = scalar_lea.hbm %s2075_s4, 8192 }
 0x2e3   : > { %p1285_p9 = scmp.ne.s32.totalorder %s1993_s12, %s1284_s7  ;;  %p1289_p5 = scmp.lt.u32.totalorder %s1993_s12, %s2075_s4 }
 0x2e4   : > { %p1290_p11 = scmp.lt.u32.totalorder %s1288_s25, %s1284_s7  ;;  %p1292_p4 = scmp.lt.u32.totalorder %s1284_s7, %s1993_s12 }
 0x2e5   : > { %p1286_p1 = pnand %p1285_p9, %p1469_p12 }
 0x2e6   : > { %p1291_p2 = por %p1290_p11, %p1289_p5 }
 0x2e7   : > { %p1287_p0 = pneg %p1286_p1 }
 0x2e8   : > { %p1293_p6 = por %p1292_p4, %p1291_p2 }
 0x2ea   : > { %p1294_p8 = pnand %p1293_p6, %p1287_p0 }
 0x2ec   : > { %1297 = shalt.err (!%p1294_p8)
}
 0x2ed   : > { %s1348_s29 = smov 128   ;;  %s1349_s20 = smov 8  }
 0x2ee   : > { %1154 = dma.vmem_to_hbm [thread:$0]  (%p1469_p12), %s1995_s21, 4096, %s1993_s12, %s852_s13, %s1348_s29, %s1348_s29, %s1349_s20  }
 0x2ef PF: > { %s880_s19 = sand.u32 1, %s1328_s15   ;;  %p2104_p10 = scmp.ne.s32.totalorder %s2080_s22, 0 }
 0x2f0   : > { %p2105_p13 = scmp.ge.s32.totalorder %s1340_s18, 2  ;;  %s881_s23 = scalar_lea.sflag [#allocation4], %s880_s19 }
 0x2f2   : > { %p1165_p3 = pnand %p2105_p13, %p2104_p10 }
 0x2f4   : > { %1323 = dma.done.wait (!%p1165_p3), %s881_s23, 4096  }
 0x2f5   : > { %1325 = vsyncadd (!%p1165_p3), %s881_s23, 4294963200  ;;  %p18_p7 = scmp.ge.s32.totalorder %s1431_s27, 4   ;;  %s2106_s15 = smov %s1332_s16 }
 0x2f6   : > { %s2107_s16 = smov %s1336_s17  ;;  %s2108_s17 = smov %s1465_s24 }
 0x2f7   : > { %s2109_s18 = smov %s1431_s27  ;;  %20 = sbr.rel (!%p18_p7) target bundleno = 6 (0x6), region = 85 }
 0x2fe   :  { %886 = vsyncpa [#allocation3], 1 }
 0x2ff   :  { %888 = vsyncpa [#allocation3 + $0x1], 1 }
 0x300   :  { %889 = vsyncpa [#allocation6], 1 }
 0x301   :  { %890 = vsyncpa [#allocation4], 1 }
 0x302   :  { %892 = vsyncpa [#allocation4 + $0x1], 1 }

</bundles_post_ra>
